<compile_context>
chip_gen: v7x
topology: tpu7x:2x2x1
jax: 0.10.0
libtpu: 0.0.40
codegen_flags: <defaults>
</compile_context>

<pallas_src>
import functools

import jax
import jax.numpy as jnp
from jax.experimental import pallas as pl
from jax.experimental.pallas import tpu as pltpu


def _round_up(x, m):
    return ((x + m - 1) // m) * m


def _patch_gemm_kernel(p_ref, w_ref, b_ref, o_ref):
    # p_ref: (tm, K)  bf16 patch vectors
    # w_ref: (K, En)  bf16 flattened conv weight (resident across all steps)
    # b_ref: (1, En)  f32 bias                   (resident across all steps)
    # o_ref: (tm, En) output tile in the caller's dtype
    acc = jnp.dot(p_ref[...], w_ref[...], preferred_element_type=jnp.float32)
    o_ref[...] = (acc + b_ref[...]).astype(o_ref.dtype)


@functools.partial(jax.jit, static_argnames=("patch_size",))
def patch_embed(x, weight, bias, patch_size):
    """x: (B, C, H, W) NCHW, weight: (E, C, ph, pw), bias: (E,).

    Returns (B, num_patches, E) == PyTorch PatchEmbed forward
    (flatten=True, norm_layer=None -> Identity).  Matmul operands are
    bf16-quantized (f32 accumulation) -- documented deviation from f32 Conv2d.
    """
    B, C, H, W = x.shape
    ph, pw = patch_size
    E = weight.shape[0]
    assert H % ph == 0 and W % pw == 0
    gh, gw = H // ph, W // pw
    n_patches = gh * gw
    K = C * ph * pw
    M = B * n_patches

    compute_dtype = jnp.bfloat16
    out_dtype = x.dtype

    # --- glue: patch extraction (single fused cast+transpose pass under jit) ---
    # (B, C, gh, ph, gw, pw) -> (B, gh, gw, C, ph, pw) -> (M, K)
    patches = (x.astype(compute_dtype)
               .reshape(B, C, gh, ph, gw, pw)
               .transpose(0, 2, 4, 1, 3, 5)
               .reshape(M, K))

    # Weight / bias: tiny -> pad E up to a 128 multiple for lane-dense output.
    En = _round_up(E, 128)
    w_mat = weight.reshape(E, K).T.astype(compute_dtype)          # (K, E)
    w_mat = jnp.pad(w_mat, ((0, 0), (0, En - E)))                 # (K, En)
    b_mat = jnp.pad(bias.reshape(1, E).astype(jnp.float32),
                    ((0, 0), (0, En - E)))                        # (1, En)

    # M tile: 512 rows (8-aligned) or the full M if smaller (full-dim block is
    # exempt from the 8-multiple rule).  Trailing partial block is fine.
    tm = M if M <= 512 else 512
    grid = (pl.cdiv(M, tm),)

    out = pl.pallas_call(
        _patch_gemm_kernel,
        out_shape=jax.ShapeDtypeStruct((M, En), out_dtype),
        grid_spec=pltpu.PrefetchScalarGridSpec(
            num_scalar_prefetch=0,
            grid=grid,
            in_specs=[
                pl.BlockSpec((tm, K), lambda i: (i, 0)),    # patches: stream over M
                pl.BlockSpec((K, En), lambda i: (0, 0)),    # weight: resident
                pl.BlockSpec((1, En), lambda i: (0, 0)),    # bias: resident
            ],
            out_specs=pl.BlockSpec((tm, En), lambda i: (i, 0)),
        ),
        compiler_params=pltpu.CompilerParams(
            dimension_semantics=("parallel",),
        ),
    )(patches, w_mat, b_mat)

    # Strip E padding (no-op when E % 128 == 0) and restore (B, N, E).
    if En != E:
        out = out[:, :E]
    return out.reshape(B, n_patches, E)


if __name__ == "__main__":
    # Small, consistent shapes: img_size=16, patch_size=4, in_chans=4, embed_dim=32
    B, C, H, W = 2, 4, 16, 16
    ph = pw = 4
    E = 32

    key = jax.random.PRNGKey(0)
    kx, kw, kb = jax.random.split(key, 3)
    x = jax.random.normal(kx, (B, C, H, W), dtype=jnp.float32)
    weight = jax.random.normal(kw, (E, C, ph, pw), dtype=jnp.float32) * 0.02
    bias = jax.random.normal(kb, (E,), dtype=jnp.float32) * 0.02

    out = patch_embed(x, weight, bias, (ph, pw))
    out = jax.block_until_ready(out)
    assert out.shape == (B, (H // ph) * (W // pw), E)

    def conv_ref(xi, wi):
        r = jax.lax.conv_general_dilated(
            xi, wi, window_strides=(ph, pw), padding="VALID",
            dimension_numbers=("NCHW", "OIHW", "NCHW"))
        r = r + bias.reshape(1, E, 1, 1)
        return r.reshape(B, E, -1).transpose(0, 2, 1)   # (B, N, E)

    # Tight check vs. a reference using the same bf16-quantized operands
    # (kernel accumulates in f32, so only summation order differs).
    ref_q = conv_ref(x.astype(jnp.bfloat16).astype(jnp.float32),
                     weight.astype(jnp.bfloat16).astype(jnp.float32))
    assert jnp.allclose(out, ref_q, atol=1e-3, rtol=1e-3)

    # Loose sanity check vs. the full-precision Conv2d reference.
    ref_f32 = conv_ref(x, weight)
    assert jnp.allclose(out, ref_f32, atol=3e-2, rtol=3e-2)

    print("KERNEL_OK")
</pallas_src>

<mosaic_0001>
module attributes {stable_mosaic.version = 11 : i64} {
  func.func @_patch_gemm_kernel(%arg0: i32, %arg1: memref<32x64xbf16, #tpu.memory_space<vmem>>, %arg2: memref<64x128xbf16, #tpu.memory_space<vmem>>, %arg3: memref<1x128xf32, #tpu.memory_space<vmem>>, %arg4: memref<32x128xf32, #tpu.memory_space<vmem>>) attributes {dimension_semantics = [#tpu.dimension_semantics<parallel>], iteration_bounds = array<i64: 1>, scalar_prefetch = 0 : i64, scratch_operands = 0 : i64, tpu.core_type = #tpu.core_type<tc>, window_params = [{transform_indices = @transform_0, window_bounds = array<i64: 32, 64>}, {pipeline_mode = #tpu.pipeline_mode<synchronous>, transform_indices = @transform_1, window_bounds = array<i64: 64, 128>}, {pipeline_mode = #tpu.pipeline_mode<synchronous>, transform_indices = @transform_2, window_bounds = array<i64: 1, 128>}, {transform_indices = @transform_3, window_bounds = array<i64: 32, 128>}]} {
    %c0 = arith.constant 0 : index
    %c0_0 = arith.constant 0 : index
    %0 = vector.load %arg1[%c0, %c0_0] : memref<32x64xbf16, #tpu.memory_space<vmem>>, vector<32x64xbf16>
    %c0_1 = arith.constant 0 : index
    %c0_2 = arith.constant 0 : index
    %1 = vector.load %arg2[%c0_1, %c0_2] : memref<64x128xbf16, #tpu.memory_space<vmem>>, vector<64x128xbf16>
    %cst = arith.constant dense<0.000000e+00> : vector<32x128xf32>
    %2 = tpu.matmul %0, %1, %cst {dimension_numbers = #tpu.dot_dimension_numbers<[1], [0], [0], [1], [0, 0, 1, 1], [], []>} : vector<32x64xbf16>, vector<64x128xbf16>, vector<32x128xf32> -> vector<32x128xf32>
    %c0_3 = arith.constant 0 : index
    %c0_4 = arith.constant 0 : index
    %3 = vector.load %arg3[%c0_3, %c0_4] : memref<1x128xf32, #tpu.memory_space<vmem>>, vector<1x128xf32>
    %4 = vector.broadcast %3 : vector<1x128xf32> to vector<32x128xf32>
    %5 = arith.addf %2, %4 : vector<32x128xf32>
    %c0_5 = arith.constant 0 : index
    %c0_6 = arith.constant 0 : index
    %6 = vector.load %arg4[%c0_5, %c0_6] : memref<32x128xf32, #tpu.memory_space<vmem>>, vector<32x128xf32>
    tpu.vector_store %arg4[%c0_5, %c0_6], %5 {strides = array<i32>} : memref<32x128xf32, #tpu.memory_space<vmem>>, vector<32x128xf32>,
    return
  }
  func.func @transform_0(%arg0: i32) -> (i32, i32) {
    %c0_i32 = arith.constant 0 : i32
    %c0_i32_0 = arith.constant 0 : i32
    return %arg0, %c0_i32 : i32, i32
  }
  func.func @transform_1(%arg0: i32) -> (i32, i32) {
    %c0_i32 = arith.constant 0 : i32
    %c0_i32_0 = arith.constant 0 : i32
    %c0_i32_1 = arith.constant 0 : i32
    return %c0_i32, %c0_i32_0 : i32, i32
  }
  func.func @transform_2(%arg0: i32) -> (i32, i32) {
    %c0_i32 = arith.constant 0 : i32
    %c0_i32_0 = arith.constant 0 : i32
    %c0_i32_1 = arith.constant 0 : i32
    return %c0_i32, %c0_i32_0 : i32, i32
  }
  func.func @transform_3(%arg0: i32) -> (i32, i32) {
    %c0_i32 = arith.constant 0 : i32
    %c0_i32_0 = arith.constant 0 : i32
    return %arg0, %c0_i32 : i32, i32
  }
}

</mosaic_0001>

<bundles_post_ra>
// kernel: patch_embed.1
= control target key start
LH: loop header
LB: loop body
LE: loop exit
PB: predicated region body
PF: predicated region fallthrough
CT: control target
= control target key end

     0   :  { %vm69_vm0 = vcmask 523264   ;;  %s261_s0 = inlined_call_operand.vmem [shape: bf16[32,64], index: 0, kind: input, shape index: {}]   ;;  %s262_s1 = inlined_call_operand.vmem [shape: bf16[64,128], index: 1, kind: input, shape index: {}]   ;;  %s263_s2 = inlined_call_operand.vmem [shape: f32[1,128], index: 2, kind: input, shape index: {}]   ;;  %s264_s3 = inlined_call_operand.hbm [shape: f32[32,128], index: 3, kind: output, shape index: {}]  }
   0x1   :  { %v175_v0 = vld [vmem:[%s262_s1] sm:$0xff]   ;;  %v176_v1 = vld [vmem:[%s262_s1 + $0x8] sm:$0xff]   ;;  %v177_v2 = vld [vmem:[%s262_s1 + $0x10] sm:$0xff]  }
   0x2   :  { %160 = vmatprep.subr.bf16.mxu0 %v175_v0  ;;  %v179_v3 = vld [vmem:[%s261_s0] sm:$0xff]  }
   0x3   :  { %161 = vmatpush3.bf16.msra.mxu0 %v175_v0  ;;  %168 = vmatprep.mubr.msk.bf16.mxu0 %vm69_vm0, %v179_v3 }
   0x4   :  { %162 = vmatprep.subr.bf16.mxu0 %v176_v1 }
   0x5   :  { %8 = vsyncpa [#allocation3], 0  ;;  %v178_v4 = vld [vmem:[%s262_s1 + $0x18] sm:$0xff]   ;;  %v180_v5 = vld [vmem:[%s261_s0 + $0x8] sm:$0xff]   ;;  %s205_s26 = smov [#allocation2]  }
   0x6   :  { %v145_v6 = vld [vmem:[%s263_s2] ss:$0 sm:$0xff]  ;;  %s134_s27 = sshll.u32 %s205_s26, 4  ;;  %s135_s27 = int_to_ptr.vmem [resolvable:$true] %s134_s27 }
   0x7   :  { %163 = vmatpush3.bf16.msra.mxu0 %v176_v1  ;;  %s181_s0 = scalar_lea.vmem %s135_s27, 512  ;;  %p186_p1 = scmp.lt.s32.totalorder %s135_s27, %s135_s27 }
   0x8   :  { %164 = vmatprep.subr.bf16.mxu0 %v177_v2  ;;  %p182_p0 = scmp.ne.s32.totalorder %s135_s27, %s181_s0  ;;  %p187_p2 = scmp.lt.s32.totalorder %s181_s0, %s181_s0 }
   0xa   :  { %p188_p3 = por %p187_p2, %p186_p1 }
   0xb   :  { %165 = vmatpush3.bf16.msra.mxu0 %v177_v2 }
   0xc   :  { %166 = vmatprep.subr.bf16.mxu0 %v178_v4  ;;  %p189_p4 = pnand %p188_p3, %p182_p0 }
   0xf   :  { %167 = vmatpush3.bf16.msra.mxu0 %v178_v4 }
  0x12   :  { %169 = vmatmul.mubr.msk.bf16.vlgmr.msra.gmra.mrb[0].mxu0 %vm69_vm0, %v180_v5 }
  0xe5   :  { %v170_v7 = vpop.f32.mrb[0].mxu0 }
  0xe6   :  { %v119_v8 = vadd.f32 %v170_v7, %v145_v6  ;;  %v110_v9 = vpop.f32.mrb[1].mxu0 }
  0xe7   :  { %v111_v10 = vadd.f32 %v145_v6, %v110_v9  ;;  %v171_v11 = vpop.f32.mrb[2].mxu0 }
  0xe8   :  { %127 = vst [vmem:[#allocation2 + $0x10] sm:$0xff] %v119_v8  ;;  %v122_v12 = vadd.f32 %v171_v11, %v145_v6  ;;  %v113_v13 = vpop.f32.mrb[3].mxu0 }
  0xe9   :  { %125 = vst [vmem:[#allocation2] sm:$0xff] %v111_v10  ;;  %v114_v14 = vadd.f32 %v145_v6, %v113_v13 }
  0xea   :  { %128 = vst [vmem:[#allocation2 + $0x18] sm:$0xff] %v122_v12 }
  0xeb   :  { %126 = vst [vmem:[#allocation2 + $0x8] sm:$0xff] %v114_v14 }
  0xec   :  { %192 = shalt.err (!%p189_p4)
}
  0xed   :  { %s193_s28 = scalar_lea.hbm %s264_s3, 512 }
  0xee   :  { %p194_p5 = scmp.ne.s32.totalorder %s264_s3, %s193_s28  ;;  %p197_p6 = scmp.lt.u32.totalorder %s193_s28, %s264_s3 }
  0xf0   :  { %p199_p7 = pnand %p197_p6, %p194_p5 }
  0xf2   :  { %202 = shalt.err (!%p199_p7)
}
  0xf3   :  { %s206_s6 = smov 128   ;;  %s207_s7 = smov 8  }
  0xf4   :  { %140 = dma.vmem_to_hbm [thread:$0]  %s135_s27, 512, %s264_s3, [#allocation3], %s206_s6, %s206_s6, %s207_s7  }
  0xf5   :  { %203 = dma.done.wait [#allocation3], 512  }
  0xf6   :  { %204 = vsyncadd [#allocation3], 4294966784 }
  0xf7   :  { %144 = vsyncpa [#allocation3], 1 }

</bundles_post_ra>
